<compile_context>
chip_gen: v7x
topology: tpu7x:2x2x1
jax: 0.10.0
libtpu: 0.0.40
codegen_flags: <defaults>
</compile_context>

<pallas_src>
import jax
import jax.numpy as jnp
from jax.experimental import pallas as pl
from jax.experimental.pallas import tpu as pltpu

LANE = 128                            # TPU lane width; keeps DMA slices lane-dense
TARGET_CHUNK_BYTES = 8 * 1024 * 1024  # ~8 MiB per DMA: large, contiguous transfers
MAX_CHUNKS = 64                       # bound the (statically unrolled) issue loop
N_INFLIGHT = 4                        # DMAs kept in flight (2-4 recommended)


def _resolve_dims(dim, total):
    """Resolve a single -1 the way torch.Tensor.view does."""
    dims = list(dim)
    if dims.count(-1) > 1:
        raise ValueError("only one -1 allowed in view dims")
    if -1 in dims:
        known = 1
        for d in dims:
            if d != -1:
                known *= d
        if known == 0 or total % known != 0:
            raise ValueError(f"cannot view {total} elements as {dim}")
        dims[dims.index(-1)] = total // known
    prod = 1
    for d in dims:
        prod *= d
    if prod != total:
        raise ValueError(f"cannot view {total} elements as {dim}")
    return tuple(dims)


def _make_hbm_copy_kernel(chunks, n_inflight):
    """Build a kernel doing a chunked HBM->HBM DMA copy.

    `chunks` is a static list of (start_row, n_rows) covering [0, rows);
    up to `n_inflight` DMAs are kept outstanding.
    """
    n = len(chunks)

    def kernel(x_hbm, o_hbm, sem):
        def dma(idx):
            start, size = chunks[idx]
            return pltpu.make_async_copy(
                x_hbm.at[pl.ds(start, size), :],
                o_hbm.at[pl.ds(start, size), :],
                sem.at[idx % n_inflight])

        # Prime the pipeline.
        for c in range(min(n_inflight, n)):
            dma(c).start()
        # Retire in order; each retirement frees its semaphore slot for the
        # next chunk, keeping up to n_inflight transfers outstanding.
        for c in range(n):
            dma(c).wait()
            nxt = c + n_inflight
            if nxt < n:
                dma(nxt).start()

    return kernel


def _hbm_copy_2d(x2d):
    """Copy a lane-dense (rows, 128) HBM buffer to a fresh HBM buffer."""
    rows, lane = x2d.shape
    itemsize = jnp.dtype(x2d.dtype).itemsize
    row_bytes = lane * itemsize

    # Rows per DMA chunk: ~TARGET_CHUNK_BYTES, but never more than MAX_CHUNKS
    # chunks in total (the issue loop is statically unrolled in the kernel).
    chunk_rows = max(1, TARGET_CHUNK_BYTES // row_bytes)
    chunk_rows = max(chunk_rows, -(-rows // MAX_CHUNKS))

    n_full, tail = divmod(rows, chunk_rows)
    chunks = [(c * chunk_rows, chunk_rows) for c in range(n_full)]
    if tail:
        chunks.append((n_full * chunk_rows, tail))
    n_inflight = min(N_INFLIGHT, len(chunks))

    return pl.pallas_call(
        _make_hbm_copy_kernel(chunks, n_inflight),
        out_shape=jax.ShapeDtypeStruct((rows, lane), x2d.dtype),
        in_specs=[pl.BlockSpec(memory_space=pl.ANY)],   # raw HBM ref, no auto-DMA
        out_specs=pl.BlockSpec(memory_space=pl.ANY),    # raw HBM ref, DMA-written
        scratch_shapes=[pltpu.SemaphoreType.DMA((n_inflight,))],
        cost_estimate=pl.CostEstimate(
            flops=0,
            transcendentals=0,
            bytes_accessed=2 * rows * lane * itemsize,
        ),
    )(x2d)


def pallas_view(x, dim, materialize=False):
    """Equivalent of View(dim)(x) == x.view(*dim).

    Default: metadata-only reshape (what torch.view is) — zero HBM traffic.
    materialize=True: return a freshly materialized buffer, produced by the
    Pallas HBM->HBM DMA kernel (no VMEM round trip).
    """
    total = int(x.size)
    out_dims = _resolve_dims(dim, total)

    if not materialize or total == 0:
        return x.reshape(out_dims)           # O(1): view is metadata-only

    if total % LANE != 0:
        # Ragged tail (< 128 elems): a lane-dense 2-D layout would require a
        # pad + post-slice (extra full passes over HBM), so return the exact
        # metadata reshape instead — strictly cheaper, same semantics.
        return x.reshape(out_dims)

    flat2d = x.reshape(total // LANE, LANE)  # metadata-only for contiguous x
    out2d = _hbm_copy_2d(flat2d)
    return out2d.reshape(out_dims)


if __name__ == "__main__":
    key = jax.random.PRNGKey(0)

    # Small NCHW-style input: batch=2, channels=4, H=W=16
    x = jax.random.normal(key, (2, 4, 16, 16), dtype=jnp.float32)
    dim = (2, 4, -1)            # View(dim=(2, 4, -1)): flatten the spatial dims
    ref = x.reshape(2, 4, 256)

    # Kernel path: explicit materialized copy via chunked HBM->HBM DMA.
    y = jax.block_until_ready(pallas_view(x, dim, materialize=True))
    assert y.shape == (2, 4, 256), y.shape
    assert y.dtype == x.dtype
    assert bool(jnp.array_equal(y, ref))

    # Default path: metadata-only reshape (exact torch.view semantics).
    y0 = jax.block_until_ready(pallas_view(x, dim))
    assert y0.shape == (2, 4, 256)
    assert bool(jnp.array_equal(y0, ref))

    # Ragged element count (not a multiple of 128): metadata fallback, no pad/slice.
    x2 = jax.random.normal(jax.random.PRNGKey(1), (3, 5), dtype=jnp.float32)
    y2 = jax.block_until_ready(pallas_view(x2, (-1,), materialize=True))
    assert y2.shape == (15,)
    assert bool(jnp.array_equal(y2, x2.reshape(-1)))

    print("KERNEL_OK")
</pallas_src>

<mosaic_0001>
module attributes {stable_mosaic.version = 11 : i64} {
  func.func @kernel(%arg0: memref<16x128xf32, #tpu.memory_space<any>>, %arg1: memref<16x128xf32, #tpu.memory_space<any>>, %arg2: memref<1x!tpu.dma_semaphore, #tpu.memory_space<semaphore_mem>>) attributes {dimension_semantics = [], scalar_prefetch = 0 : i64, scratch_operands = 1 : i64, tpu.core_type = #tpu.core_type<tc>} {
    %c0_i32 = arith.constant 0 : i32
    %c0_i32_0 = arith.constant 0 : i32
    %c0_i32_1 = arith.constant 0 : i32
    %0 = tpu.memref_slice %arg0[%c0_i32_0, %c0_i32_1] : memref<16x128xf32, #tpu.memory_space<any>> -> memref<16x128xf32, #tpu.memory_space<any>>
    %c0_i32_2 = arith.constant 0 : i32
    %c0_i32_3 = arith.constant 0 : i32
    %1 = tpu.memref_slice %arg1[%c0_i32_2, %c0_i32_3] : memref<16x128xf32, #tpu.memory_space<any>> -> memref<16x128xf32, #tpu.memory_space<any>>
    %2 = tpu.memref_slice %arg2[%c0_i32] : memref<1x!tpu.dma_semaphore, #tpu.memory_space<semaphore_mem>> -> memref<1x!tpu.dma_semaphore, #tpu.memory_space<semaphore_mem>>
    %3 = tpu.memref_squeeze %2 : memref<1x!tpu.dma_semaphore, #tpu.memory_space<semaphore_mem>> -> memref<!tpu.dma_semaphore, #tpu.memory_space<semaphore_mem>>
    tpu.enqueue_dma source(%0 : memref<16x128xf32, #tpu.memory_space<any>>) target(%1 : memref<16x128xf32, #tpu.memory_space<any>>) target_semaphore(%3 : memref<!tpu.dma_semaphore, #tpu.memory_space<semaphore_mem>>)
    %c0_i32_4 = arith.constant 0 : i32
    %c0_i32_5 = arith.constant 0 : i32
    %c0_i32_6 = arith.constant 0 : i32
    %4 = tpu.memref_slice %arg0[%c0_i32_5, %c0_i32_6] : memref<16x128xf32, #tpu.memory_space<any>> -> memref<16x128xf32, #tpu.memory_space<any>>
    %c0_i32_7 = arith.constant 0 : i32
    %c0_i32_8 = arith.constant 0 : i32
    %5 = tpu.memref_slice %arg1[%c0_i32_7, %c0_i32_8] : memref<16x128xf32, #tpu.memory_space<any>> -> memref<16x128xf32, #tpu.memory_space<any>>
    %6 = tpu.memref_slice %arg2[%c0_i32_4] : memref<1x!tpu.dma_semaphore, #tpu.memory_space<semaphore_mem>> -> memref<1x!tpu.dma_semaphore, #tpu.memory_space<semaphore_mem>>
    %7 = tpu.memref_squeeze %6 : memref<1x!tpu.dma_semaphore, #tpu.memory_space<semaphore_mem>> -> memref<!tpu.dma_semaphore, #tpu.memory_space<semaphore_mem>>
    tpu.wait_dma2 semaphore(%7 : memref<!tpu.dma_semaphore, #tpu.memory_space<semaphore_mem>>) src(%4 : memref<16x128xf32, #tpu.memory_space<any>>) dst(%5 : memref<16x128xf32, #tpu.memory_space<any>>)
    return
  }
}

</mosaic_0001>

<bundles_post_ra>
// kernel: tpu_custom_call.1
= control target key start
LH: loop header
LB: loop body
LE: loop exit
PB: predicated region body
PF: predicated region fallthrough
CT: control target
= control target key end

     0   :  { %s34_s6 = smov [#allocation2]   ;;  %s35_s7 = smov [#allocation3]   ;;  %s53_s0 = inlined_call_operand.hbm [shape: f32[16,128], index: 0, kind: input, shape index: {}]   ;;  %s54_s1 = inlined_call_operand.hbm [shape: f32[16,128], index: 1, kind: output, shape index: {}]  }
   0x1   :  { %s36_s8 = smov 0  }
   0x2   :  { %18 = dma.general %s53_s0, 256, %s54_s1, %s34_s6, %s35_s7, [#allocation4], %s36_s8, 0  }
   0x3   :  { %32 = dma.done.wait [#allocation2], 256 }
   0x4   :  { %33 = vsyncadd [#allocation2], 4294967040 }
   0x5   :  { %22 = vsyncmov [#allocation2] }
   0x8   :  { %s23_s13 = vpop.sfrf %22 }
   0x9   :  { %p28_p0 = scmp.ne.s32.totalorder %s23_s13, 0 }
   0xb   :  { %27 = shalt.err (%p28_p0)  }

</bundles_post_ra>
